<compile_context>
chip_gen: v7x
topology: tpu7x:2x2x1
jax: 0.10.0
libtpu: 0.0.40
codegen_flags: <defaults>
</compile_context>

<pallas_src>
import functools

import jax
import jax.numpy as jnp
from jax.experimental import pallas as pl
from jax.experimental.pallas import tpu as pltpu


def mlp_kernel(xT_ref, w1_ref, b1_ref, w2_ref, b2_ref, w3_ref, b3_ref, o_ref):
    # xT block: (num_nodes, tb) — batch rides the 128-lane axis.
    xT = xT_ref[...].astype(jnp.bfloat16)

    # Layer 1: (hidden, num_nodes) @ (num_nodes, tb) -> (hidden, tb); bf16 in,
    # f32 accumulate on the MXU; bias is a (hidden, 1) column (lane broadcast).
    h1 = jnp.dot(w1_ref[...], xT, preferred_element_type=jnp.float32)
    h1 = jnp.maximum(h1 + b1_ref[...], 0.0)

    # Layer 2: (hidden, hidden) @ (hidden, tb) -> (hidden, tb).
    h2 = jnp.dot(w2_ref[...], h1.astype(jnp.bfloat16),
                 preferred_element_type=jnp.float32)
    h2 = jnp.maximum(h2 + b2_ref[...], 0.0)

    # Layer 3 (hidden -> 1): per-lane dot via VPU multiply with the (hidden, 1)
    # weight column + XLU sublane reduce; b3 is a scalar read from SMEM.
    out = jnp.sum(h2 * w3_ref[...], axis=0, keepdims=True) + b3_ref[0, 0]

    # Lane-dense (1, tb) store.
    o_ref[...] = out.astype(o_ref.dtype)


@functools.partial(jax.jit, static_argnames=("block_batch",))
def wgan_discriminator_forward(x, params, *, block_batch=16384):
    """x: (batch, num_nodes).  Returns (batch, 1) f32."""
    w1, b1, w2, b2, w3, b3 = params
    batch, num_nodes = x.shape
    hidden = w1.shape[0]

    # Batch rides the lane axis inside the kernel.
    x_t = x.T  # (num_nodes, batch)

    # Lane-tile size: multiple of 128 unless it equals the full batch.
    tb = min(block_batch, batch)
    if tb != batch:
        tb = max(128, (tb // 128) * 128)
    elif batch >= 256:
        # v7x megacore: guarantee >= 2 grid steps so both TensorCores get work.
        tb = max(128, (pl.cdiv(batch, 2) // 128) * 128)
    grid = (pl.cdiv(batch, tb),)

    resident = lambda shape: pl.BlockSpec(shape, lambda i: (0,) * len(shape))

    out_row = pl.pallas_call(
        mlp_kernel,
        out_shape=jax.ShapeDtypeStruct((1, batch), jnp.float32),
        grid=grid,
        in_specs=[
            pl.BlockSpec((num_nodes, tb), lambda i: (0, i)),      # xT (lane-tiled)
            resident((hidden, num_nodes)),                        # w1 (bf16)
            resident((hidden, 1)),                                # b1 (f32 column)
            resident((hidden, hidden)),                           # w2 (bf16)
            resident((hidden, 1)),                                # b2 (f32 column)
            resident((hidden, 1)),                                # w3 (f32 column)
            pl.BlockSpec(memory_space=pltpu.MemorySpace.SMEM),    # b3 scalar
        ],
        out_specs=pl.BlockSpec((1, tb), lambda i: (0, i)),
        compiler_params=pltpu.CompilerParams(
            dimension_semantics=("parallel",),
            vmem_limit_bytes=32 * 1024 * 1024,
        ),
    )(x_t, w1, b1, w2, b2, w3, b3)

    return out_row.reshape(batch, 1)


def init_params(key, num_nodes, hidden_size):
    """Deterministic PyTorch-style (Kaiming-uniform-ish) init.

    Weights are stored in PyTorch's (out_features, in_features) orientation
    (what the batch-in-lanes kernel consumes directly); layer-1/2 weights are
    pre-cast to bf16 once here (MXU operands), biases are (out, 1) f32
    columns, and the layer-3 weight is a (hidden, 1) f32 column."""
    k1, k2, k3, k4, k5, k6 = jax.random.split(key, 6)

    def lin(kw, kb, fan_in, fan_out):
        bound = 1.0 / jnp.sqrt(jnp.float32(fan_in))
        w = jax.random.uniform(kw, (fan_out, fan_in), jnp.float32, -bound, bound)
        b = jax.random.uniform(kb, (fan_out, 1), jnp.float32, -bound, bound)
        return w, b

    w1, b1 = lin(k1, k2, num_nodes, hidden_size)
    w2, b2 = lin(k3, k4, hidden_size, hidden_size)
    w3, b3 = lin(k5, k6, hidden_size, 1)            # w3: (1, hidden), b3: (1, 1)
    return (w1.astype(jnp.bfloat16), b1,
            w2.astype(jnp.bfloat16), b2,
            w3.T,                                    # (hidden, 1) column
            b3)                                      # (1, 1) scalar -> SMEM


def _reference(x, params):
    """Plain-JAX reference mirroring the kernel's bf16-operand / f32-acc math."""
    w1, b1, w2, b2, w3, b3 = params
    h = jnp.dot(w1, x.T.astype(jnp.bfloat16),
                preferred_element_type=jnp.float32) + b1
    h = jnp.maximum(h, 0.0)
    h = jnp.dot(w2, h.astype(jnp.bfloat16),
                preferred_element_type=jnp.float32) + b2
    h = jnp.maximum(h, 0.0)
    out = jnp.sum(h * w3, axis=0, keepdims=True) + b3[0, 0]
    return out.T  # (batch, 1)


if __name__ == "__main__":
    num_nodes = 16
    hidden_size = 32

    key = jax.random.PRNGKey(0)
    kx1, kx2, kp = jax.random.split(key, 3)
    params = init_params(kp, num_nodes, hidden_size)

    # 1) Small batch: single grid step, lane tile == full batch.
    batch = 8
    x = jax.random.normal(kx1, (batch, num_nodes), jnp.float32)
    out = jax.block_until_ready(wgan_discriminator_forward(x, params))
    ref = _reference(x, params)
    assert out.shape == (batch, 1), out.shape
    assert jnp.allclose(out, ref, atol=1e-4, rtol=1e-3), "mismatch (batch=8)"

    # 2) Multi-step grid with a ragged final lane tile (exercises pipelining
    #    and the discarded out-of-bounds boundary lanes).
    batch2 = 1000
    x2 = jax.random.normal(kx2, (batch2, num_nodes), jnp.float32)
    out2 = jax.block_until_ready(
        wgan_discriminator_forward(x2, params, block_batch=256))
    ref2 = _reference(x2, params)
    assert out2.shape == (batch2, 1), out2.shape
    assert jnp.allclose(out2, ref2, atol=1e-4, rtol=1e-3), "mismatch (batch=1000)"

    print("KERNEL_OK")
</pallas_src>

<mosaic_0001>
module attributes {stable_mosaic.version = 11 : i64} {
  func.func @mlp_kernel(%arg0: i32, %arg1: memref<16x8xf32, #tpu.memory_space<vmem>>, %arg2: memref<32x16xbf16, #tpu.memory_space<vmem>>, %arg3: memref<32x1xf32, #tpu.memory_space<vmem>>, %arg4: memref<32x32xbf16, #tpu.memory_space<vmem>>, %arg5: memref<32x1xf32, #tpu.memory_space<vmem>>, %arg6: memref<32x1xf32, #tpu.memory_space<vmem>>, %arg7: memref<1x1xf32, #tpu.memory_space<smem>>, %arg8: memref<1x8xf32, #tpu.memory_space<vmem>>) attributes {dimension_semantics = [#tpu.dimension_semantics<parallel>], iteration_bounds = array<i64: 1>, scalar_prefetch = 0 : i64, scratch_operands = 0 : i64, tpu.core_type = #tpu.core_type<tc>, window_params = [{transform_indices = @transform_0, window_bounds = array<i64: 16, 8>}, {pipeline_mode = #tpu.pipeline_mode<synchronous>, transform_indices = @transform_1, window_bounds = array<i64: 32, 16>}, {pipeline_mode = #tpu.pipeline_mode<synchronous>, transform_indices = @transform_2, window_bounds = array<i64: 32, 1>}, {pipeline_mode = #tpu.pipeline_mode<synchronous>, transform_indices = @transform_3, window_bounds = array<i64: 32, 32>}, {pipeline_mode = #tpu.pipeline_mode<synchronous>, transform_indices = @transform_4, window_bounds = array<i64: 32, 1>}, {pipeline_mode = #tpu.pipeline_mode<synchronous>, transform_indices = @transform_5, window_bounds = array<i64: 32, 1>}, {transform_indices = @transform_6, window_bounds = array<i64: 1, 1>}, {transform_indices = @transform_7, window_bounds = array<i64: 1, 8>}]} {
    %c0 = arith.constant 0 : index
    %c0_0 = arith.constant 0 : index
    %0 = vector.load %arg1[%c0, %c0_0] : memref<16x8xf32, #tpu.memory_space<vmem>>, vector<16x8xf32>
    %1 = arith.truncf %0 : vector<16x8xf32> to vector<16x8xbf16>
    %c0_1 = arith.constant 0 : index
    %c0_2 = arith.constant 0 : index
    %2 = vector.load %arg2[%c0_1, %c0_2] : memref<32x16xbf16, #tpu.memory_space<vmem>>, vector<32x16xbf16>
    %cst = arith.constant dense<0.000000e+00> : vector<32x8xf32>
    %3 = tpu.matmul %2, %1, %cst {dimension_numbers = #tpu.dot_dimension_numbers<[1], [0], [0], [1], [0, 0, 1, 1], [], []>} : vector<32x16xbf16>, vector<16x8xbf16>, vector<32x8xf32> -> vector<32x8xf32>
    %c0_3 = arith.constant 0 : index
    %c0_4 = arith.constant 0 : index
    %4 = vector.load %arg3[%c0_3, %c0_4] : memref<32x1xf32, #tpu.memory_space<vmem>>, vector<32x1xf32>
    %5 = vector.broadcast %4 : vector<32x1xf32> to vector<32x8xf32>
    %6 = arith.addf %3, %5 : vector<32x8xf32>
    %cst_5 = arith.constant 0.000000e+00 : f32
    %7 = vector.broadcast %cst_5 : f32 to vector<32x8xf32>
    %8 = arith.maximumf %6, %7 : vector<32x8xf32>
    %c0_6 = arith.constant 0 : index
    %c0_7 = arith.constant 0 : index
    %9 = vector.load %arg4[%c0_6, %c0_7] : memref<32x32xbf16, #tpu.memory_space<vmem>>, vector<32x32xbf16>
    %10 = arith.truncf %8 : vector<32x8xf32> to vector<32x8xbf16>
    %cst_8 = arith.constant dense<0.000000e+00> : vector<32x8xf32>
    %11 = tpu.matmul %9, %10, %cst_8 {dimension_numbers = #tpu.dot_dimension_numbers<[1], [0], [0], [1], [0, 0, 1, 1], [], []>} : vector<32x32xbf16>, vector<32x8xbf16>, vector<32x8xf32> -> vector<32x8xf32>
    %c0_9 = arith.constant 0 : index
    %c0_10 = arith.constant 0 : index
    %12 = vector.load %arg5[%c0_9, %c0_10] : memref<32x1xf32, #tpu.memory_space<vmem>>, vector<32x1xf32>
    %13 = vector.broadcast %12 : vector<32x1xf32> to vector<32x8xf32>
    %14 = arith.addf %11, %13 : vector<32x8xf32>
    %cst_11 = arith.constant 0.000000e+00 : f32
    %15 = vector.broadcast %cst_11 : f32 to vector<32x8xf32>
    %16 = arith.maximumf %14, %15 : vector<32x8xf32>
    %c0_12 = arith.constant 0 : index
    %c0_13 = arith.constant 0 : index
    %17 = vector.load %arg6[%c0_12, %c0_13] : memref<32x1xf32, #tpu.memory_space<vmem>>, vector<32x1xf32>
    %18 = vector.broadcast %17 : vector<32x1xf32> to vector<32x8xf32>
    %19 = arith.mulf %16, %18 : vector<32x8xf32>
    %cst_14 = arith.constant dense<0.000000e+00> : vector<8xf32>
    %20 = vector.multi_reduction <add>, %19, %cst_14 [0] : vector<32x8xf32> to vector<8xf32>
    %21 = vector.shape_cast %20 : vector<8xf32> to vector<1x8xf32>
    %c0_15 = arith.constant 0 : index
    %c0_16 = arith.constant 0 : index
    %22 = memref.load %arg7[%c0_15, %c0_16] : memref<1x1xf32, #tpu.memory_space<smem>>
    %23 = vector.broadcast %22 : f32 to vector<1x8xf32>
    %24 = arith.addf %21, %23 : vector<1x8xf32>
    %c0_17 = arith.constant 0 : index
    %c0_18 = arith.constant 0 : index
    %25 = vector.load %arg8[%c0_17, %c0_18] : memref<1x8xf32, #tpu.memory_space<vmem>>, vector<1x8xf32>
    tpu.vector_store %arg8[%c0_17, %c0_18], %24 {strides = array<i32>} : memref<1x8xf32, #tpu.memory_space<vmem>>, vector<1x8xf32>,
    return
  }
  func.func @transform_0(%arg0: i32) -> (i32, i32) {
    %c0_i32 = arith.constant 0 : i32
    %c0_i32_0 = arith.constant 0 : i32
    return %c0_i32, %arg0 : i32, i32
  }
  func.func @transform_1(%arg0: i32) -> (i32, i32) {
    %c0_i32 = arith.constant 0 : i32
    %c0_i32_0 = arith.constant 0 : i32
    %c0_i32_1 = arith.constant 0 : i32
    return %c0_i32, %c0_i32_0 : i32, i32
  }
  func.func @transform_2(%arg0: i32) -> (i32, i32) {
    %c0_i32 = arith.constant 0 : i32
    %c0_i32_0 = arith.constant 0 : i32
    %c0_i32_1 = arith.constant 0 : i32
    return %c0_i32, %c0_i32_0 : i32, i32
  }
  func.func @transform_3(%arg0: i32) -> (i32, i32) {
    %c0_i32 = arith.constant 0 : i32
    %c0_i32_0 = arith.constant 0 : i32
    %c0_i32_1 = arith.constant 0 : i32
    return %c0_i32, %c0_i32_0 : i32, i32
  }
  func.func @transform_4(%arg0: i32) -> (i32, i32) {
    %c0_i32 = arith.constant 0 : i32
    %c0_i32_0 = arith.constant 0 : i32
    %c0_i32_1 = arith.constant 0 : i32
    return %c0_i32, %c0_i32_0 : i32, i32
  }
  func.func @transform_5(%arg0: i32) -> (i32, i32) {
    %c0_i32 = arith.constant 0 : i32
    %c0_i32_0 = arith.constant 0 : i32
    %c0_i32_1 = arith.constant 0 : i32
    return %c0_i32, %c0_i32_0 : i32, i32
  }
  func.func @transform_6(%arg0: i32) -> (i32, i32) {
    %c0_i32 = arith.constant 0 : i32
    %c0_i32_0 = arith.constant 0 : i32
    %c0_i32_1 = arith.constant 0 : i32
    return %c0_i32, %c0_i32_0 : i32, i32
  }
  func.func @transform_7(%arg0: i32) -> (i32, i32) {
    %c0_i32 = arith.constant 0 : i32
    %c0_i32_0 = arith.constant 0 : i32
    return %c0_i32, %arg0 : i32, i32
  }
}

</mosaic_0001>

<bundles_post_ra>
// kernel: wgan_discriminator_forward.1
= control target key start
LH: loop header
LB: loop body
LE: loop exit
PB: predicated region body
PF: predicated region fallthrough
CT: control target
= control target key end

     0   :  { %vm70_vm0 = vcmask 130048   ;;  %v352_v4 = vmov 0   ;;  %s467_s0 = inlined_call_operand.vmem [shape: f32[16,8], index: 0, kind: input, shape index: {}]   ;;  %s468_s1 = inlined_call_operand.vmem [shape: bf16[32,16], index: 1, kind: input, shape index: {}]   ;;  %s469_s2 = inlined_call_operand.vmem [shape: f32[32,1], index: 2, kind: input, shape index: {}]   ;;  %s470_s3 = inlined_call_operand.vmem [shape: bf16[32,32], index: 3, kind: input, shape index: {}]   ;;  %s471_s4 = inlined_call_operand.vmem [shape: f32[32,1], index: 4, kind: input, shape index: {}]   ;;  %s472_s5 = inlined_call_operand.vmem [shape: f32[32,1], index: 5, kind: input, shape index: {}]   ;;  %s473_s6 = inlined_call_operand.<no memory space> [shape: f32[1,1], index: 6, kind: input, shape index: {}]   ;;  %s474_s7 = inlined_call_operand.hbm [shape: f32[1,8], index: 7, kind: output, shape index: {}]  }
   0x1   :  { %v29_v0 = vld [vmem:[%s467_s0] sm:$0xff]  ;;  %v30_v1 = vld [vmem:[%s467_s0 + $0x8] sm:$0xff]  ;;  %322 = vset.pattern.permute.xlu0 %v352_v4  ;;  %323 = vset.pattern.permute.xlu1 %v352_v4  ;;  %v38_v7 = vld [vmem:[%s469_s2 + $0x10] sm:$0xff] }
   0x2   :  { %v31_v2 = vpack.c.bf16 %v30_v1, %v29_v0  ;;  %v324_v3 = vld [vmem:[%s468_s1] sm:$0xff]   ;;  %v325_v6 = vld [vmem:[%s468_s1 + $0x8] sm:$0xff]   ;;  %52 = vperm.xlu1 %323, %v38_v7   ;;  %v39_v9 = vld [vmem:[%s469_s2 + $0x18] sm:$0xff] }
   0x3   :  { %v36_v5 = vld [vmem:[%s469_s2] sm:$0xff]  ;;  %308 = vmatprep.mubr.msk.bf16.mxu0 %vm70_vm0, %v324_v3  ;;  %v37_v8 = vld [vmem:[%s469_s2 + $0x8] sm:$0xff] }
   0x4   :  { %306 = vmatprep.subr.bf16.mxu0 %v31_v2  ;;  %42 = vperm.xlu0 %322, %v36_v5  }
   0x5   :  { %307 = vmatpush3.bf16.msra.mxu0 %v31_v2 }
   0x8   :  { %309 = vmatmul.mubr.msk.bf16.vlgmr.msra.gmra.mrb[0].mxu0 %vm70_vm0, %v325_v6  ;;  %47 = vperm.xlu0 %322, %v37_v8  }
   0x9   :  { %13 = vsyncpa [#allocation4], 0  ;;  %57 = vperm.xlu1 %323, %v39_v9   ;;  %v136_v10 = vld [vmem:[%s471_s4] sm:$0xff]  ;;  %v137_v11 = vld [vmem:[%s471_s4 + $0x8] sm:$0xff]  ;;  %vm170_vm1 = vcmask 261120   ;;  %vm258_vm2 = vcmask 64512  }
   0xa   :  { %v138_v12 = vld [vmem:[%s471_s4 + $0x10] sm:$0xff]  ;;  %v139_v13 = vld [vmem:[%s471_s4 + $0x18] sm:$0xff]  ;;  %v230_v14 = vld [vmem:[%s472_s5] sm:$0xff]  ;;  %s353_s10 = smov [#allocation3]   ;;  %vm275_vm3 = vcmask 57344  }
   0xb   :  { %v231_v15 = vld [vmem:[%s472_s5 + $0x8] sm:$0xff]  ;;  %v232_v16 = vld [vmem:[%s472_s5 + $0x10] sm:$0xff]  ;;  %v233_v17 = vld [vmem:[%s472_s5 + $0x18] sm:$0xff]  ;;  %s283_s0 = sshll.u32 %s353_s10, 4  ;;  %s284_s0 = int_to_ptr.vmem [resolvable:$true] %s283_s0 }
   0xc   :  { %142 = vperm.xlu0 %322, %v136_v10   ;;  %v326_v18 = vld [vmem:[%s470_s3] sm:$0xff]   ;;  %v327_v37 = vld [vmem:[%s470_s3 + $0x8] sm:$0xff]   ;;  %v273_v10 = vstv %s473_s6  ;;  %s328_s11 = scalar_lea.vmem %s284_s0, 16  ;;  %s332_s12 = scalar_lea.vmem %s284_s0, 32 }
   0xd   :  { %147 = vperm.xlu1 %323, %v137_v11   ;;  %316 = vmatprep.mubr.msk.bf16.mxu1 %vm170_vm1, %v326_v18  ;;  %p329_p0 = scmp.ne.s32.totalorder %s284_s0, %s328_s11  ;;  %p333_p1 = scmp.lt.s32.totalorder %s284_s0, %s284_s0 }
   0xe   :  { %p334_p2 = scmp.lt.s32.totalorder %s332_s12, %s328_s11 }
  0x10   :  { %152 = vperm.xlu0 %322, %v138_v12   ;;  %p335_p3 = por %p334_p2, %p333_p1 }
  0x11   :  { %157 = vperm.xlu1 %323, %v139_v13  }
  0x12   :  { %p336_p4 = pnand %p335_p3, %p329_p0 }
  0x14   :  { %236 = vperm.xlu0 %322, %v230_v14  }
  0x15   :  { %241 = vperm.xlu1 %323, %v231_v15  }
  0x18   :  { %246 = vperm.xlu0 %322, %v232_v16  }
  0x19   :  { %251 = vperm.xlu1 %323, %v233_v17  }
  0x81   :  { %v53_v19 = vpop.permute.xlu1 %52 }
  0x83   :  { %v43_v20 = vpop.permute.xlu0 %42 }
  0x87   :  { %v48_v27 = vpop.permute.xlu0 %47 }
  0x88   :  { %v58_v24 = vpop.permute.xlu1 %57 }
  0x8b   :  { %v143_v38 = vpop.permute.xlu0 %142 }
  0x8c   :  { %v148_v39 = vpop.permute.xlu1 %147 }
  0x8f   :  { %v153_v40 = vpop.permute.xlu0 %152 }
  0x90   :  { %v158_v41 = vpop.permute.xlu1 %157 }
  0x93   :  { %v237_v43 = vpop.permute.xlu0 %236 }
  0x94   :  { %v242_v48 = vpop.permute.xlu1 %241 }
  0x97   :  { %v247_v57 = vpop.permute.xlu0 %246 }
  0x98   :  { %v252_v60 = vpop.permute.xlu1 %251 }
  0xdb   :  { %v310_v21 = vpop.f32.mrb[0].mxu0 }
  0xdc   :  { %v120_v22 = vadd.f32 %v310_v21, %v53_v19  ;;  %v111_v23 = vpop.f32.mrb[1].mxu0 }
  0xdd   :  { %v112_v25 = vadd.f32 %v111_v23, %v43_v20  ;;  %v311_v26 = vpop.f32.mrb[2].mxu0 }
  0xde   :  { %v123_v28 = vadd.f32 %v311_v26, %v58_v24  ;;  %v114_v29 = vpop.f32.mrb[3].mxu0  ;;  %v128_v31 = vmax.f32 %v120_v22, 0.0 }
  0xdf   :  { %v115_v30 = vadd.f32 %v114_v29, %v48_v27  ;;  %v126_v33 = vmax.f32 %v112_v25, 0.0 }
  0xe0   :  { %v129_v32 = vmax.f32 %v123_v28, 0.0 }
  0xe1   :  { %v127_v34 = vmax.f32 %v115_v30, 0.0 }
  0xe2   :  { %v135_v35 = vpack.c.bf16 %v129_v32, %v128_v31 }
  0xe3   :  { %v134_v36 = vpack.c.bf16 %v127_v34, %v126_v33 }
  0xe5   :  { %312 = vmatprep.subr.bf16.mxu1 %v134_v36 }
  0xe6   :  { %313 = vmatpush3.bf16.msra.mxu1 %v134_v36 }
  0xe7   :  { %314 = vmatprep.subr.bf16.mxu1 %v135_v35 }
  0xea   :  { %315 = vmatpush3.bf16.msra.mxu1 %v135_v35 }
  0xed   :  { %317 = vmatmul.mubr.msk.bf16.vlgmr.msra.gmra.mrb[0].mxu1 %vm170_vm1, %v327_v37 }
 0x1c0   :  { %v318_v42 = vpop.f32.mrb[0].mxu1 }
 0x1c1   :  { %v220_v44 = vadd.f32 %v318_v42, %v153_v40  ;;  %v211_v45 = vpop.f32.mrb[1].mxu1 }
 0x1c2   :  { %v212_v46 = vadd.f32 %v211_v45, %v143_v38  ;;  %v319_v47 = vpop.f32.mrb[2].mxu1 }
 0x1c3   :  { %v223_v49 = vadd.f32 %v319_v47, %v158_v41  ;;  %v214_v50 = vpop.f32.mrb[3].mxu1  ;;  %v228_v51 = vmax.f32 %v220_v44, 0.0 }
 0x1c4   :  { %v226_v52 = vmax.f32 %v212_v46, 0.0  ;;  %v215_v53 = vadd.f32 %v214_v50, %v148_v39 }
 0x1c5   :  { %v229_v55 = vmax.f32 %v223_v49, 0.0  ;;  %v256_v58 = vmul.f32 %v247_v57, %v228_v51 }
 0x1c6   :  { %v254_v54 = vmul.f32 %v237_v43, %v226_v52  ;;  %v227_v56 = vmax.f32 %v215_v53, 0.0 }
 0x1c7   :  { %v257_v62 = vmul.f32 %v252_v60, %v229_v55  ;;  %v262_v1 = vsel %vm258_vm2, %v256_v58, 0.0 }
 0x1c8   :  { %v255_v59 = vmul.f32 %v242_v48, %v227_v56  ;;  %v259_v61 = vsel %vm258_vm2, %v254_v54, 0.0 }
 0x1c9   :  { %v264_v3 = vsel %vm258_vm2, %v257_v62, 0.0 }
 0x1ca   :  { %v260_v63 = vsel %vm258_vm2, %v255_v59, 0.0 }
 0x1cb   :  { %v261_v0 = vadd.f32 %v260_v63, %v259_v61 }
 0x1cd   :  { %v263_v2 = vadd.f32 %v262_v1, %v261_v0 }
 0x1cf   :  { %v265_v4 = vadd.f32 %v264_v3, %v263_v2 }
 0x1d1   :  { %v266_v5 = vrot.slane %v265_v4, 4 }
 0x1d3   :  { %v267_v6 = vadd.f32 %v266_v5, %v265_v4 }
 0x1d5   :  { %v268_v7 = vrot.slane %v267_v6, 2 }
 0x1d7   :  { %v269_v8 = vadd.f32 %v268_v7, %v267_v6 }
 0x1d9   :  { %v270_v9 = vrot.slane %v269_v8, 1 }
 0x1db   :  { %v271_v11 = vadd.f32 %v270_v9, %v269_v8 }
 0x1dd   :  { %v274_v12 = vadd.f32 %v273_v10, %v271_v11 }
 0x1df   :  { %276 = vst.msk [vmem:[#allocation3] sm:$0x1] %vm275_vm3, %v274_v12 }
 0x1e0   :  { %339 = shalt.err (!%p336_p4)
}
 0x1e1   :  { %s340_s15 = scalar_lea.hbm %s474_s7, 16 }
 0x1e2   :  { %p341_p5 = scmp.ne.s32.totalorder %s474_s7, %s340_s15  ;;  %p344_p6 = scmp.lt.u32.totalorder %s340_s15, %s474_s7 }
 0x1e4   :  { %p346_p7 = pnand %p344_p6, %p341_p5 }
 0x1e6   :  { %349 = shalt.err (!%p346_p7)
}
 0x1e7   :  { %286 = dma.vmem_to_hbm [thread:$0]  %s284_s0, 16, %s474_s7, [#allocation4]  }
 0x1e8   :  { %350 = dma.done.wait [#allocation4], 16  }
 0x1e9   :  { %351 = vsyncadd [#allocation4], 4294967280 }
 0x1ea   :  { %290 = vsyncpa [#allocation4], 1 }

</bundles_post_ra>
